<compile_context>
chip_gen: v6e
topology: v6e:2x2x1
jax: 0.10.0
libtpu: 0.0.40
codegen_flags: <defaults>
</compile_context>

<pallas_src>
import functools

import jax
import jax.numpy as jnp
from jax.experimental import pallas as pl
from jax.experimental.pallas import tpu as pltpu


def _leaky_relu(x, slope=0.01):
    # 2 VALU ops (mul + max) instead of cmp + mul + select.
    return jnp.maximum(x, slope * x)


def _round_up(x, m):
    return ((x + m - 1) // m) * m


def _prefers_bf16_vpu():
    """bf16 VALU exists on v6e/v7x; keep f32 activations on older parts (v5e...)."""
    try:
        kind = jax.devices()[0].device_kind.lower()
    except Exception:
        return True
    return not any(tag in kind for tag in ("v2", "v3", "v4", "v5"))


def edge_score_kernel(xT_ref, w1T_ref, c_ref, w2T_ref, b2_ref, w3_ref,
                      out_ref, *, act_dtype):
    f32 = jnp.float32

    # Layer 1 (transposed): (H1, F+1) @ (F+1, T) -> (H1, T); f32 accumulation,
    # f32 column-bias add (bias precision preserved), then 2-op leaky_relu.
    h1 = (jnp.dot(w1T_ref[...], xT_ref[...], preferred_element_type=f32)
          + c_ref[...])                                              # (H1, T)
    h1 = _leaky_relu(h1).astype(act_dtype)

    # Layer 2 (transposed): (H2, H1) @ (H1, T) -> (H2, T); f32 accumulation.
    h2 = (jnp.dot(w2T_ref[...], h1, preferred_element_type=f32)
          + b2_ref[...])                                             # (H2, T)
    h2 = _leaky_relu(h2)

    # Layer 3: single output row -> VPU multiply + sublane (XLU) reduction.
    # The result is already a lane-dense (1, T) row -> unmasked stores.
    out_ref[...] = jnp.sum(h2 * w3_ref[...], axis=0, keepdims=True)  # (1, T)


def edge_generation_forward(budget, target, sub_graph_nodes, new_feat, adj_tensor,
                            wlabel, wsec, params):
    """Eval-mode (train_flag=False) EdgeGeneration.forward."""
    f32 = jnp.float32
    bf16 = jnp.bfloat16
    L = params["label_dim"]
    F = params["feat_dim"]

    new_feat = new_feat.astype(f32)

    # ---- weight-side fusion (wrapper; constant-folds under jit) ----
    W12 = jnp.dot(params["weight1"], params["weight2"]).astype(f32)      # (F, L)

    W1 = params["W1"]
    W1_tar = W1[0:L]
    W1_sub = W1[L:2 * L]
    W1_add = W1[2 * L:3 * L]
    W1_adj = W1[3 * L:3 * L + 1]
    W1_wl = W1[3 * L + 1:3 * L + 1 + F]
    W1_ws = W1[3 * L + 1 + F:]

    # Row-constant part of layer 1 (tiny M=1 matmuls: leave to XLA).
    tar_xw = new_feat[target][None, :] @ W12                             # (1, L)
    add_xw = new_feat[-1][None, :] @ W12                                 # (1, L)
    const_col = (params["b1"]
                 + tar_xw @ W1_tar
                 + add_xw @ W1_add
                 + wlabel.astype(f32) @ W1_wl
                 + wsec.astype(f32) @ W1_ws).T                           # (H1, 1)

    # sub_xw @ W1_sub == sub_feat @ (W12 @ W1_sub); adjacency column folds in
    # as one extra input feature with weight row W1_adj.
    W_augT = jnp.concatenate([W12 @ W1_sub, W1_adj], axis=0).T           # (H1, F+1)

    # ---- data-side glue: gathers + transpose (plain JAX) ----
    sub_feat = new_feat[sub_graph_nodes]                                 # (N, F)
    norm_a = adj_tensor[sub_graph_nodes, target][:, None].astype(f32)    # (N, 1)
    # TODO(synk): sparse adj_tensor branch and the adj.shape[1]==1 branch are not implemented.
    XT = jnp.concatenate([sub_feat, norm_a], axis=1).T                   # (F+1, N)

    F1, N = XT.shape
    H1 = W_augT.shape[0]
    H2 = params["W2"].shape[1]

    # ---- column (row-of-X) tiling: big lane-dense tiles; >=2 grid steps for
    # mid/large N so "parallel" can shard rows across v7x's two TensorCores.
    TILE = 2048
    n8 = _round_up(N, 8)
    if n8 <= 256:
        tile = n8                                          # tiny N: one block
    else:
        tile = min(TILE, _round_up((N + 1) // 2, 128))     # >=2 steps, lane-dense
    N_pad = _round_up(N, tile)
    if N_pad != N:
        XT = jnp.pad(XT, ((0, 0), (0, N_pad - N)))

    act_dtype = bf16 if _prefers_bf16_vpu() else f32

    inputs = (
        XT.astype(bf16),                     # (F+1, N_pad)   tiled over columns
        W_augT.astype(bf16),                 # (H1, F+1)      resident
        const_col.astype(f32),               # (H1, 1)   f32  resident
        params["W2"].T.astype(act_dtype),    # (H2, H1)       resident
        params["b2"].T.astype(f32),          # (H2, 1)   f32  resident
        params["W3"].astype(f32),            # (H2, 1)   f32  resident
    )

    in_specs = [
        pl.BlockSpec((F1, tile), lambda i: (0, i)),
        pl.BlockSpec((H1, F1), lambda i: (0, 0)),
        pl.BlockSpec((H1, 1), lambda i: (0, 0)),
        pl.BlockSpec((H2, H1), lambda i: (0, 0)),
        pl.BlockSpec((H2, 1), lambda i: (0, 0)),
        pl.BlockSpec((H2, 1), lambda i: (0, 0)),
    ]
    out_specs = pl.BlockSpec((1, tile), lambda i: (0, i))

    logits_row = pl.pallas_call(
        functools.partial(edge_score_kernel, act_dtype=act_dtype),
        out_shape=jax.ShapeDtypeStruct((1, N_pad), jnp.float32),
        grid_spec=pltpu.PrefetchScalarGridSpec(
            num_scalar_prefetch=0,
            grid=(N_pad // tile,),
            in_specs=in_specs,
            out_specs=out_specs,
        ),
        compiler_params=pltpu.CompilerParams(
            dimension_semantics=("parallel",)),
    )(*inputs)

    # b3 is a uniform shift (does not change top-k ordering); add it once here.
    out = logits_row[0, :N] + params["b3"][0, 0]                         # (N,)
    logits = out[:, None]                                                # (N, 1)

    # ---- glue: eval-mode top-k selection (matches torch.topk + scatter) ----
    _, indices = jax.lax.top_k(out, budget)
    score = jnp.zeros_like(out).at[indices].set(1.0)
    # TODO(synk): train_flag=True straight-through st_topk path not implemented (forward value equals the hard one-hot).
    score_idx = jnp.asarray(sub_graph_nodes, dtype=jnp.int32).reshape(1, -1)
    return score, score_idx, logits


def _reference_logits(target, sub_graph_nodes, new_feat, adj, wlabel, wsec, p):
    sub_feat = new_feat[sub_graph_nodes]
    tar_feat = new_feat[target][None, :]
    add_feat = new_feat[-1][None, :]
    norm_a = adj[sub_graph_nodes, target][:, None]
    N = sub_feat.shape[0]

    def xw(x):
        return (x @ p["weight1"]) @ p["weight2"]

    concat = jnp.concatenate(
        [jnp.tile(xw(tar_feat), (N, 1)), xw(sub_feat), jnp.tile(xw(add_feat), (N, 1)),
         norm_a, jnp.tile(wlabel, (N, 1)), jnp.tile(wsec, (N, 1))], axis=1)

    def lrelu(x):
        return jnp.where(x >= 0, x, 0.01 * x)

    h1 = lrelu(concat @ p["W1"] + p["b1"])
    h2 = lrelu(h1 @ p["W2"] + p["b2"])
    return h2 @ p["W3"] + p["b3"]


if __name__ == "__main__":
    key = jax.random.PRNGKey(0)
    ks = jax.random.split(key, 10)

    feat_dim, hid = 16, 32
    tar_num = 1
    label_dim = 8
    H1, H2 = 512, 32
    in_dim = 3 * label_dim + 2 * feat_dim + tar_num   # 57

    def kaiming(k, fan_in, fan_out):
        return ((2.0 / fan_in) ** 0.5) * jax.random.normal(k, (fan_in, fan_out), jnp.float32)

    params = {
        "weight1": 0.2 * jax.random.normal(ks[0], (feat_dim, hid), jnp.float32),
        "weight2": 0.2 * jax.random.normal(ks[1], (hid, label_dim), jnp.float32),
        "W1": kaiming(ks[2], in_dim, H1),
        "b1": (1.0 / in_dim ** 0.5) * jax.random.uniform(ks[3], (1, H1), jnp.float32, -1.0, 1.0),
        "W2": kaiming(ks[4], H1, H2),
        "b2": (1.0 / H1 ** 0.5) * jax.random.uniform(ks[5], (1, H2), jnp.float32, -1.0, 1.0),
        "W3": kaiming(ks[6], H2, 1),
        "b3": (1.0 / H2 ** 0.5) * jax.random.uniform(ks[7], (1, 1), jnp.float32, -1.0, 1.0),
        "label_dim": label_dim, "feat_dim": feat_dim,
    }

    def run_case(kx, num_nodes, n_sub, budget):
        k0, k1, k2, k3, k4 = jax.random.split(kx, 5)
        new_feat = jax.random.normal(k0, (num_nodes, feat_dim), jnp.float32)
        adj = jax.nn.softmax(
            jax.random.normal(k1, (num_nodes, num_nodes), jnp.float32), axis=-1)
        wlabel = jax.random.normal(k2, (1, feat_dim), jnp.float32)
        wsec = jax.random.normal(k3, (1, feat_dim), jnp.float32)
        sub = jax.random.permutation(k4, num_nodes)[:n_sub].astype(jnp.int32)
        target = jnp.int32(2)

        score, score_idx, logits = edge_generation_forward(
            budget, target, sub, new_feat, adj, wlabel, wsec, params)
        jax.block_until_ready((score, score_idx, logits))

        # correctness vs a pure-JAX f32 reference (kernel uses bf16 operands)
        ref = _reference_logits(target, sub, new_feat, adj, wlabel, wsec, params)
        assert logits.shape == (n_sub, 1)
        assert score.shape == (n_sub,) and score_idx.shape == (1, n_sub)
        assert float(score.sum()) == float(budget)
        assert jnp.allclose(logits, ref, atol=5e-2, rtol=5e-2), "kernel/reference mismatch"

    # small case: single-tile grid (tile == N_pad)
    run_case(ks[8], num_nodes=32, n_sub=8, budget=3)
    # larger case: multi-tile grid (tile=256, 2 parallel steps), lane-dense output
    run_case(ks[9], num_nodes=512, n_sub=300, budget=5)

    print("KERNEL_OK")
</pallas_src>

<mosaic_0001>
module attributes {stable_mosaic.version = 11 : i64} {
  func.func @edge_score_kernel(%arg0: i32, %arg1: memref<17x8xbf16, #tpu.memory_space<vmem>>, %arg2: memref<512x17xbf16, #tpu.memory_space<vmem>>, %arg3: memref<512x1xf32, #tpu.memory_space<vmem>>, %arg4: memref<32x512xbf16, #tpu.memory_space<vmem>>, %arg5: memref<32x1xf32, #tpu.memory_space<vmem>>, %arg6: memref<32x1xf32, #tpu.memory_space<vmem>>, %arg7: memref<1x8xf32, #tpu.memory_space<vmem>>) attributes {dimension_semantics = [#tpu.dimension_semantics<parallel>], iteration_bounds = array<i64: 1>, scalar_prefetch = 0 : i64, scratch_operands = 0 : i64, tpu.core_type = #tpu.core_type<tc>, window_params = [{transform_indices = @transform_0, window_bounds = array<i64: 17, 8>}, {pipeline_mode = #tpu.pipeline_mode<synchronous>, transform_indices = @transform_1, window_bounds = array<i64: 512, 17>}, {pipeline_mode = #tpu.pipeline_mode<synchronous>, transform_indices = @transform_2, window_bounds = array<i64: 512, 1>}, {pipeline_mode = #tpu.pipeline_mode<synchronous>, transform_indices = @transform_3, window_bounds = array<i64: 32, 512>}, {pipeline_mode = #tpu.pipeline_mode<synchronous>, transform_indices = @transform_4, window_bounds = array<i64: 32, 1>}, {pipeline_mode = #tpu.pipeline_mode<synchronous>, transform_indices = @transform_5, window_bounds = array<i64: 32, 1>}, {transform_indices = @transform_6, window_bounds = array<i64: 1, 8>}]} {
    %c0 = arith.constant 0 : index
    %c0_0 = arith.constant 0 : index
    %0 = vector.load %arg2[%c0, %c0_0] : memref<512x17xbf16, #tpu.memory_space<vmem>>, vector<512x17xbf16>
    %c0_1 = arith.constant 0 : index
    %c0_2 = arith.constant 0 : index
    %1 = vector.load %arg1[%c0_1, %c0_2] : memref<17x8xbf16, #tpu.memory_space<vmem>>, vector<17x8xbf16>
    %cst = arith.constant dense<0.000000e+00> : vector<512x8xf32>
    %2 = tpu.matmul %0, %1, %cst {dimension_numbers = #tpu.dot_dimension_numbers<[1], [0], [0], [1], [0, 0, 1, 1], [], []>} : vector<512x17xbf16>, vector<17x8xbf16>, vector<512x8xf32> -> vector<512x8xf32>
    %c0_3 = arith.constant 0 : index
    %c0_4 = arith.constant 0 : index
    %3 = vector.load %arg3[%c0_3, %c0_4] : memref<512x1xf32, #tpu.memory_space<vmem>>, vector<512x1xf32>
    %4 = vector.broadcast %3 : vector<512x1xf32> to vector<512x8xf32>
    %5 = arith.addf %2, %4 : vector<512x8xf32>
    %cst_5 = arith.constant 0.00999999977 : f32
    %6 = vector.broadcast %cst_5 : f32 to vector<512x8xf32>
    %7 = arith.mulf %6, %5 : vector<512x8xf32>
    %8 = arith.maximumf %5, %7 : vector<512x8xf32>
    %9 = arith.truncf %8 : vector<512x8xf32> to vector<512x8xbf16>
    %c0_6 = arith.constant 0 : index
    %c0_7 = arith.constant 0 : index
    %10 = vector.load %arg4[%c0_6, %c0_7] : memref<32x512xbf16, #tpu.memory_space<vmem>>, vector<32x512xbf16>
    %cst_8 = arith.constant dense<0.000000e+00> : vector<32x8xf32>
    %11 = tpu.matmul %10, %9, %cst_8 {dimension_numbers = #tpu.dot_dimension_numbers<[1], [0], [0], [1], [0, 0, 1, 1], [], []>} : vector<32x512xbf16>, vector<512x8xbf16>, vector<32x8xf32> -> vector<32x8xf32>
    %c0_9 = arith.constant 0 : index
    %c0_10 = arith.constant 0 : index
    %12 = vector.load %arg5[%c0_9, %c0_10] : memref<32x1xf32, #tpu.memory_space<vmem>>, vector<32x1xf32>
    %13 = vector.broadcast %12 : vector<32x1xf32> to vector<32x8xf32>
    %14 = arith.addf %11, %13 : vector<32x8xf32>
    %cst_11 = arith.constant 0.00999999977 : f32
    %15 = vector.broadcast %cst_11 : f32 to vector<32x8xf32>
    %16 = arith.mulf %15, %14 : vector<32x8xf32>
    %17 = arith.maximumf %14, %16 : vector<32x8xf32>
    %c0_12 = arith.constant 0 : index
    %c0_13 = arith.constant 0 : index
    %18 = vector.load %arg6[%c0_12, %c0_13] : memref<32x1xf32, #tpu.memory_space<vmem>>, vector<32x1xf32>
    %19 = vector.broadcast %18 : vector<32x1xf32> to vector<32x8xf32>
    %20 = arith.mulf %17, %19 : vector<32x8xf32>
    %cst_14 = arith.constant dense<0.000000e+00> : vector<8xf32>
    %21 = vector.multi_reduction <add>, %20, %cst_14 [0] : vector<32x8xf32> to vector<8xf32>
    %22 = vector.shape_cast %21 : vector<8xf32> to vector<1x8xf32>
    %c0_15 = arith.constant 0 : index
    %c0_16 = arith.constant 0 : index
    %23 = vector.load %arg7[%c0_15, %c0_16] : memref<1x8xf32, #tpu.memory_space<vmem>>, vector<1x8xf32>
    tpu.vector_store %arg7[%c0_15, %c0_16], %22 {strides = array<i32>} : memref<1x8xf32, #tpu.memory_space<vmem>>, vector<1x8xf32>,
    return
  }
  func.func @transform_0(%arg0: i32) -> (i32, i32) {
    %c0_i32 = arith.constant 0 : i32
    %c0_i32_0 = arith.constant 0 : i32
    return %c0_i32, %arg0 : i32, i32
  }
  func.func @transform_1(%arg0: i32) -> (i32, i32) {
    %c0_i32 = arith.constant 0 : i32
    %c0_i32_0 = arith.constant 0 : i32
    %c0_i32_1 = arith.constant 0 : i32
    return %c0_i32, %c0_i32_0 : i32, i32
  }
  func.func @transform_2(%arg0: i32) -> (i32, i32) {
    %c0_i32 = arith.constant 0 : i32
    %c0_i32_0 = arith.constant 0 : i32
    %c0_i32_1 = arith.constant 0 : i32
    return %c0_i32, %c0_i32_0 : i32, i32
  }
  func.func @transform_3(%arg0: i32) -> (i32, i32) {
    %c0_i32 = arith.constant 0 : i32
    %c0_i32_0 = arith.constant 0 : i32
    %c0_i32_1 = arith.constant 0 : i32
    return %c0_i32, %c0_i32_0 : i32, i32
  }
  func.func @transform_4(%arg0: i32) -> (i32, i32) {
    %c0_i32 = arith.constant 0 : i32
    %c0_i32_0 = arith.constant 0 : i32
    %c0_i32_1 = arith.constant 0 : i32
    return %c0_i32, %c0_i32_0 : i32, i32
  }
  func.func @transform_5(%arg0: i32) -> (i32, i32) {
    %c0_i32 = arith.constant 0 : i32
    %c0_i32_0 = arith.constant 0 : i32
    %c0_i32_1 = arith.constant 0 : i32
    return %c0_i32, %c0_i32_0 : i32, i32
  }
  func.func @transform_6(%arg0: i32) -> (i32, i32) {
    %c0_i32 = arith.constant 0 : i32
    %c0_i32_0 = arith.constant 0 : i32
    return %c0_i32, %arg0 : i32, i32
  }
}

</mosaic_0001>

<bundles_post_ra>
// kernel: tpu_custom_call.1
= control target key start
LH: loop header
LB: loop body
LE: loop exit
PB: predicated region body
PF: predicated region fallthrough
CT: control target
= control target key end

     0   :  { %vm742_vm0 = vcmask 1040384   ;;  %v1741_v2 = vmov 0   ;;  %vm645_vm1 = vcmask 138240   ;;  %s2428_s0 = inlined_call_operand.vmem [shape: bf16[17,8], index: 0, kind: input, shape index: {}]   ;;  %s2429_s1 = inlined_call_operand.vmem [shape: bf16[512,17], index: 1, kind: input, shape index: {}]   ;;  %s2430_s2 = inlined_call_operand.vmem [shape: f32[512,1], index: 2, kind: input, shape index: {}]   ;;  %s2431_s3 = inlined_call_operand.vmem [shape: bf16[32,512], index: 3, kind: input, shape index: {}]   ;;  %s2432_s4 = inlined_call_operand.vmem [shape: f32[32,1], index: 4, kind: input, shape index: {}]   ;;  %s2433_s5 = inlined_call_operand.vmem [shape: f32[32,1], index: 5, kind: input, shape index: {}]   ;;  %s2434_s6 = inlined_call_operand.hbm [shape: f32[1,8], index: 6, kind: output, shape index: {}]  }
   0x1   :  { %v122_v0 = vld [vmem:[%s2430_s2 + $0xf0] sm:$0xff]  ;;  %1672 = vset.pattern.permute.xlu1 %v1741_v2  ;;  %v1673_v3 = vld [vmem:[%s2428_s0 + $0x8] ss:$0 sps:$4 sm:$0x11]   ;;  %v744_v4 = vsel %vm742_vm0, 65535, %v1741_v2  ;;  %1671 = vset.pattern.permute.xlu0 %v1741_v2  ;;  %v123_v5 = vld [vmem:[%s2430_s2 + $0xf8] sm:$0xff] }
   0x2   :  { %v106_v1 = vld [vmem:[%s2430_s2 + $0x70] sm:$0xff]  ;;  %308 = vperm.xlu0 %1671, %v122_v0   ;;  %v746_v6 = vand.u32 %v1673_v3, %v744_v4  ;;  %v107_v7 = vld [vmem:[%s2430_s2 + $0x78] sm:$0xff]  ;;  %v1674_v8 = vld [vmem:[%s2428_s0] sm:$0xff]  }
   0x3   :  { %228 = vperm.xlu1 %1672, %v106_v1   ;;  %v1675_v9 = vld [vmem:[%s2429_s1] sm:$0xff]   ;;  %v1676_v10 = vld [vmem:[%s2429_s1 + $0xb0] sm:$0xff]   ;;  %v121_v12 = vld [vmem:[%s2430_s2 + $0xe8] sm:$0xff] }
   0x4   :  { %1597 = vmatprep.subr.bf16.mxu0 %v746_v6  ;;  %1665 = vmatprep.subr.bf16.mxu1 %v746_v6  ;;  %v120_v11 = vld [vmem:[%s2430_s2 + $0xe0] sm:$0xff]  ;;  %v1677_v13 = vld [vmem:[%s2429_s1 + $0x8] sm:$0xff]   ;;  %v1678_v14 = vld [vmem:[%s2429_s1 + $0xb8] sm:$0xff]  }
   0x5   :  { %1598 = vmatpush3.bf16.msra.mxu0 %v746_v6  ;;  %1667 = vmatpush3.bf16.msra.mxu1 %v746_v6  ;;  %v105_v15 = vld [vmem:[%s2430_s2 + $0x68] sm:$0xff]  ;;  %v104_v16 = vld [vmem:[%s2430_s2 + $0x60] sm:$0xff]  ;;  %v1679_v17 = vld [vmem:[%s2429_s1 + $0x10] sm:$0xff]  }
   0x6   :  { %313 = vperm.xlu0 %1671, %v123_v5   ;;  %1599 = vmatprep.subr.bf16.mxu0 %v1674_v8  ;;  %v1680_v18 = vld [vmem:[%s2429_s1 + $0xc0] sm:$0xff]   ;;  %v119_v19 = vld [vmem:[%s2430_s2 + $0xd8] sm:$0xff]  ;;  %v118_v20 = vld [vmem:[%s2430_s2 + $0xd0] sm:$0xff] }
   0x7   :  { %233 = vperm.xlu1 %1672, %v107_v7   ;;  %1666 = vmatprep.subr.bf16.mxu1 %v1674_v8  ;;  %v1681_v21 = vld [vmem:[%s2429_s1 + $0x18] sm:$0xff]   ;;  %v1682_v22 = vld [vmem:[%s2429_s1 + $0xc8] sm:$0xff]   ;;  %v102_v24 = vld [vmem:[%s2430_s2 + $0x50] sm:$0xff] }
   0x8   :  { %1601 = vmatprep.mubr.msk.bf16.mxu0 %vm645_vm1, %v1675_v9  ;;  %1645 = vmatprep.mubr.msk.bf16.mxu1 %vm645_vm1, %v1676_v10  ;;  %v103_v23 = vld [vmem:[%s2430_s2 + $0x58] sm:$0xff]  ;;  %v1683_v25 = vld [vmem:[%s2429_s1 + $0x20] sm:$0xff]   ;;  %v1684_v26 = vld [vmem:[%s2429_s1 + $0xd0] sm:$0xff]  }
   0x9   :  { %1600 = vmatpush3.bf16.msra.mxu0 %v1674_v8  ;;  %1668 = vmatpush3.bf16.msra.mxu1 %v1674_v8  ;;  %v117_v27 = vld [vmem:[%s2430_s2 + $0xc8] sm:$0xff]  ;;  %v116_v28 = vld [vmem:[%s2430_s2 + $0xc0] sm:$0xff]  ;;  %v1686_v30 = vld [vmem:[%s2429_s1 + $0xd8] sm:$0xff]  }
   0xa   :  { %298 = vperm.xlu0 %1671, %v120_v11   ;;  %v1685_v29 = vld [vmem:[%s2429_s1 + $0x28] sm:$0xff]   ;;  %v100_v32 = vld [vmem:[%s2430_s2 + $0x40] sm:$0xff]  ;;  %v1687_v33 = vld [vmem:[%s2429_s1 + $0x30] sm:$0xff]  }
   0xb   :  { %303 = vperm.xlu1 %1672, %v121_v12   ;;  %v101_v31 = vld [vmem:[%s2430_s2 + $0x48] sm:$0xff]  ;;  %v1688_v34 = vld [vmem:[%s2429_s1 + $0xe0] sm:$0xff]   ;;  %v115_v35 = vld [vmem:[%s2430_s2 + $0xb8] sm:$0xff] }
   0xc   :  { %1602 = vmatmul.mubr.msk.bf16.vlgmr.msra.gmra.mxu0 %vm645_vm1, %v1677_v13  ;;  %1646 = vmatmul.mubr.msk.bf16.vlgmr.msra.gmra.mxu1 %vm645_vm1, %v1678_v14  ;;  %v114_v36 = vld [vmem:[%s2430_s2 + $0xb0] sm:$0xff]  ;;  %v1689_v37 = vld [vmem:[%s2429_s1 + $0x38] sm:$0xff]   ;;  %v1690_v38 = vld [vmem:[%s2429_s1 + $0xe8] sm:$0xff]  }
   0xd   :  { %1605 = vmatprep.mubr.msk.bf16.mxu0 %vm645_vm1, %v1679_v17  ;;  %1649 = vmatprep.mubr.msk.bf16.mxu1 %vm645_vm1, %v1680_v18  ;;  %v99_v39 = vld [vmem:[%s2430_s2 + $0x38] sm:$0xff]  ;;  %v98_v40 = vld [vmem:[%s2430_s2 + $0x30] sm:$0xff]  ;;  %v1691_v41 = vld [vmem:[%s2429_s1 + $0x40] sm:$0xff]  }
   0xe   :  { %218 = vperm.xlu0 %1671, %v104_v16   ;;  %v1692_v42 = vld [vmem:[%s2429_s1 + $0xf0] sm:$0xff]   ;;  %v113_v43 = vld [vmem:[%s2430_s2 + $0xa8] sm:$0xff]  ;;  %v112_v44 = vld [vmem:[%s2430_s2 + $0xa0] sm:$0xff] }
   0xf   :  { %223 = vperm.xlu1 %1672, %v105_v15   ;;  %v1693_v45 = vld [vmem:[%s2429_s1 + $0x48] sm:$0xff]   ;;  %v1694_v46 = vld [vmem:[%s2429_s1 + $0xf8] sm:$0xff]   ;;  %v96_v48 = vld [vmem:[%s2430_s2 + $0x20] sm:$0xff] }
  0x10   :  { %v97_v47 = vld [vmem:[%s2430_s2 + $0x28] sm:$0xff]  ;;  %v1695_v49 = vld [vmem:[%s2429_s1 + $0x50] sm:$0xff]   ;;  %v111_v50 = vld [vmem:[%s2430_s2 + $0x98] sm:$0xff] }
  0x11   :  { %v110_v51 = vld [vmem:[%s2430_s2 + $0x90] sm:$0xff]  ;;  %v1696_v52 = vld [vmem:[%s2429_s1 + $0x58] sm:$0xff]   ;;  %v1697_v55 = vld [vmem:[%s2429_s1 + $0x60] sm:$0xff]  }
  0x12   :  { %288 = vperm.xlu0 %1671, %v118_v20   ;;  %v95_v53 = vld [vmem:[%s2430_s2 + $0x18] sm:$0xff]  ;;  %v94_v54 = vld [vmem:[%s2430_s2 + $0x10] sm:$0xff]  ;;  %v109_v56 = vld [vmem:[%s2430_s2 + $0x88] sm:$0xff] }
  0x13   :  { %293 = vperm.xlu1 %1672, %v119_v19   ;;  %v108_v57 = vld [vmem:[%s2430_s2 + $0x80] sm:$0xff]  ;;  %v1698_v58 = vld [vmem:[%s2429_s1 + $0x68] sm:$0xff]   ;;  %v1699_v61 = vld [vmem:[%s2429_s1 + $0x70] sm:$0xff]  }
  0x14   :  { %1606 = vmatmul.mubr.msk.bf16.gmra.mxu0 %vm645_vm1, %v1681_v21  ;;  %1650 = vmatmul.mubr.msk.bf16.gmra.mxu1 %vm645_vm1, %v1682_v22  ;;  %v93_v59 = vld [vmem:[%s2430_s2 + $0x8] sm:$0xff]  ;;  %v92_v60 = vld [vmem:[%s2430_s2] sm:$0xff] }
  0x15   :  { %1609 = vmatprep.mubr.msk.bf16.mxu0 %vm645_vm1, %v1683_v25  ;;  %1653 = vmatprep.mubr.msk.bf16.mxu1 %vm645_vm1, %v1684_v26 }
  0x16   :  { %208 = vperm.xlu0 %1671, %v102_v24  }
  0x17   :  { %213 = vperm.xlu1 %1672, %v103_v23  }
  0x1a   :  { %278 = vperm.xlu0 %1671, %v116_v28  }
  0x1b   :  { %283 = vperm.xlu1 %1672, %v117_v27  }
  0x1c   :  { %1610 = vmatmul.mubr.msk.bf16.gmra.mxu0 %vm645_vm1, %v1685_v29  ;;  %1654 = vmatmul.mubr.msk.bf16.gmra.mxu1 %vm645_vm1, %v1686_v30 }
  0x1d   :  { %1613 = vmatprep.mubr.msk.bf16.mxu0 %vm645_vm1, %v1687_v33  ;;  %1657 = vmatprep.mubr.msk.bf16.mxu1 %vm645_vm1, %v1688_v34 }
  0x1e   :  { %198 = vperm.xlu0 %1671, %v100_v32  }
  0x1f   :  { %203 = vperm.xlu1 %1672, %v101_v31  }
  0x22   :  { %268 = vperm.xlu0 %1671, %v114_v36  }
  0x23   :  { %273 = vperm.xlu1 %1672, %v115_v35  }
  0x24   :  { %1614 = vmatmul.mubr.msk.bf16.gmra.mxu0 %vm645_vm1, %v1689_v37  ;;  %1658 = vmatmul.mubr.msk.bf16.gmra.mxu1 %vm645_vm1, %v1690_v38 }
  0x25   :  { %1617 = vmatprep.mubr.msk.bf16.mxu0 %vm645_vm1, %v1691_v41  ;;  %1661 = vmatprep.mubr.msk.bf16.mxu1 %vm645_vm1, %v1692_v42 }
  0x26   :  { %188 = vperm.xlu0 %1671, %v98_v40  }
  0x27   :  { %193 = vperm.xlu1 %1672, %v99_v39  }
  0x2a   :  { %258 = vperm.xlu0 %1671, %v112_v44  }
  0x2b   :  { %263 = vperm.xlu1 %1672, %v113_v43  }
  0x2c   :  { %1618 = vmatmul.mubr.msk.bf16.gmra.mxu0 %vm645_vm1, %v1693_v45  ;;  %1662 = vmatmul.mubr.msk.bf16.gmra.mxu1 %vm645_vm1, %v1694_v46 }
  0x2d   :  { %1621 = vmatprep.mubr.msk.bf16.mxu0 %vm645_vm1, %v1695_v49 }
  0x2e   :  { %178 = vperm.xlu0 %1671, %v96_v48  }
  0x2f   :  { %183 = vperm.xlu1 %1672, %v97_v47  }
  0x32   :  { %248 = vperm.xlu0 %1671, %v110_v51  }
  0x33   :  { %253 = vperm.xlu1 %1672, %v111_v50  }
  0x34   :  { %1622 = vmatmul.mubr.msk.bf16.gmra.mxu0 %vm645_vm1, %v1696_v52 }
  0x35   :  { %1625 = vmatprep.mubr.msk.bf16.mxu0 %vm645_vm1, %v1697_v55 }
  0x36   :  { %168 = vperm.xlu0 %1671, %v94_v54  }
  0x37   :  { %173 = vperm.xlu1 %1672, %v95_v53  }
  0x3a   :  { %238 = vperm.xlu0 %1671, %v108_v57  }
  0x3b   :  { %243 = vperm.xlu1 %1672, %v109_v56  }
  0x3c   :  { %11 = vsyncpa [#allocation3], 0  ;;  %1626 = vmatmul.mubr.msk.bf16.gmra.mxu0 %vm645_vm1, %v1698_v58  ;;  %v155_v62 = vld [vmem:[%s2430_s2 + $0x1f8] sm:$0xff]  ;;  %v154_v63 = vld [vmem:[%s2430_s2 + $0x1f0] sm:$0xff]  ;;  %vm1403_vm2 = vcmask 64512   ;;  %vm1417_vm3 = vcmask 57344  }
  0x3d   :  { %1629 = vmatprep.mubr.msk.bf16.mxu0 %vm645_vm1, %v1699_v61  ;;  %v1700_v0 = vld [vmem:[%s2429_s1 + $0x78] sm:$0xff]   ;;  %v138_v2 = vld [vmem:[%s2430_s2 + $0x170] sm:$0xff]  ;;  %v1701_v3 = vld [vmem:[%s2429_s1 + $0x80] sm:$0xff]  }
  0x3e   :  { %158 = vperm.xlu0 %1671, %v92_v60   ;;  %v139_v1 = vld [vmem:[%s2430_s2 + $0x178] sm:$0xff]  ;;  %v153_v4 = vld [vmem:[%s2430_s2 + $0x1e8] sm:$0xff]  ;;  %v152_v5 = vld [vmem:[%s2430_s2 + $0x1e0] sm:$0xff] }
  0x3f   :  { %163 = vperm.xlu1 %1672, %v93_v59   ;;  %v1702_v6 = vld [vmem:[%s2429_s1 + $0x88] sm:$0xff]   ;;  %v136_v8 = vld [vmem:[%s2430_s2 + $0x160] sm:$0xff]  ;;  %v1703_v9 = vld [vmem:[%s2429_s1 + $0x90] sm:$0xff]  }
  0x40   :  { %v137_v7 = vld [vmem:[%s2430_s2 + $0x168] sm:$0xff]  ;;  %v151_v10 = vld [vmem:[%s2430_s2 + $0x1d8] sm:$0xff]  ;;  %v150_v11 = vld [vmem:[%s2430_s2 + $0x1d0] sm:$0xff] }
  0x41   :  { %v1704_v12 = vld [vmem:[%s2429_s1 + $0x98] sm:$0xff]   ;;  %v134_v14 = vld [vmem:[%s2430_s2 + $0x150] sm:$0xff]  ;;  %v1705_v15 = vld [vmem:[%s2429_s1 + $0xa0] sm:$0xff]  }
  0x42   :  { %468 = vperm.xlu0 %1671, %v154_v63   ;;  %v135_v13 = vld [vmem:[%s2430_s2 + $0x158] sm:$0xff]  ;;  %v149_v16 = vld [vmem:[%s2430_s2 + $0x1c8] sm:$0xff]  ;;  %v148_v17 = vld [vmem:[%s2430_s2 + $0x1c0] sm:$0xff] }
  0x43   :  { %473 = vperm.xlu1 %1672, %v155_v62   ;;  %v1706_v18 = vld [vmem:[%s2429_s1 + $0xa8] sm:$0xff]   ;;  %v132_v20 = vld [vmem:[%s2430_s2 + $0x140] sm:$0xff]  ;;  %v147_v21 = vld [vmem:[%s2430_s2 + $0x1b8] sm:$0xff] }
  0x44   :  { %1630 = vmatmul.mubr.msk.bf16.gmra.mxu0 %vm645_vm1, %v1700_v0  ;;  %v133_v19 = vld [vmem:[%s2430_s2 + $0x148] sm:$0xff]  ;;  %v146_v22 = vld [vmem:[%s2430_s2 + $0x1b0] sm:$0xff]  ;;  %v131_v23 = vld [vmem:[%s2430_s2 + $0x138] sm:$0xff] }
  0x45   :  { %1633 = vmatprep.mubr.msk.bf16.mxu0 %vm645_vm1, %v1701_v3  ;;  %v130_v24 = vld [vmem:[%s2430_s2 + $0x130] sm:$0xff]  ;;  %v145_v25 = vld [vmem:[%s2430_s2 + $0x1a8] sm:$0xff]  ;;  %v144_v26 = vld [vmem:[%s2430_s2 + $0x1a0] sm:$0xff] }
  0x46   :  { %388 = vperm.xlu0 %1671, %v138_v2   ;;  %v129_v27 = vld [vmem:[%s2430_s2 + $0x128] sm:$0xff]  ;;  %v128_v28 = vld [vmem:[%s2430_s2 + $0x120] sm:$0xff]  ;;  %v143_v29 = vld [vmem:[%s2430_s2 + $0x198] sm:$0xff] }
  0x47   :  { %393 = vperm.xlu1 %1672, %v139_v1   ;;  %v142_v30 = vld [vmem:[%s2430_s2 + $0x190] sm:$0xff]  ;;  %v127_v31 = vld [vmem:[%s2430_s2 + $0x118] sm:$0xff]  ;;  %v141_v33 = vld [vmem:[%s2430_s2 + $0x188] sm:$0xff] }
  0x48   :  { %v126_v32 = vld [vmem:[%s2430_s2 + $0x110] sm:$0xff]  ;;  %v140_v34 = vld [vmem:[%s2430_s2 + $0x180] sm:$0xff]  ;;  %v125_v35 = vld [vmem:[%s2430_s2 + $0x108] sm:$0xff] }
  0x49   :  { %v124_v36 = vld [vmem:[%s2430_s2 + $0x100] sm:$0xff]  ;;  %v1206_v39 = vld [vmem:[%s2432_s4 + $0x8] sm:$0xff]  ;;  %v1208_v43 = vld [vmem:[%s2432_s4 + $0x18] sm:$0xff] }
  0x4a   :  { %458 = vperm.xlu0 %1671, %v152_v5   ;;  %v1205_v40 = vld [vmem:[%s2432_s4] sm:$0xff]  ;;  %v1207_v44 = vld [vmem:[%s2432_s4 + $0x10] sm:$0xff]  ;;  %v1376_v47 = vld [vmem:[%s2433_s5 + $0x8] sm:$0xff] }
  0x4b   :  { %463 = vperm.xlu1 %1672, %v153_v4   ;;  %v1375_v48 = vld [vmem:[%s2433_s5] sm:$0xff]  ;;  %v1378_v50 = vld [vmem:[%s2433_s5 + $0x18] sm:$0xff]  ;;  %v1377_v51 = vld [vmem:[%s2433_s5 + $0x10] sm:$0xff] }
  0x4c   :  { %1634 = vmatmul.mubr.msk.bf16.gmra.mxu0 %vm645_vm1, %v1702_v6  ;;  %v1709_v1 = vld [vmem:[%s2431_s3 + $0x4] ss:$16 sps:$4 sm:$0xff]  }
  0x4d   :  { %1637 = vmatprep.mubr.msk.bf16.mxu0 %vm645_vm1, %v1703_v9  ;;  %1301 = vmatprep.mubr.bf16.mxu1 %v1709_v1 }
  0x4e   :  { %378 = vperm.xlu0 %1671, %v136_v8  }
  0x4f   :  { %383 = vperm.xlu1 %1672, %v137_v7  }
  0x52   :  { %448 = vperm.xlu0 %1671, %v150_v11  }
  0x53   :  { %453 = vperm.xlu1 %1672, %v151_v10  }
  0x54   :  { %1638 = vmatmul.mubr.msk.bf16.gmra.mxu0 %vm645_vm1, %v1704_v12 }
  0x55   :  { %1641 = vmatprep.mubr.msk.bf16.mxu0 %vm645_vm1, %v1705_v15 }
  0x56   :  { %368 = vperm.xlu0 %1671, %v134_v14  }
  0x57   :  { %373 = vperm.xlu1 %1672, %v135_v13  }
  0x5a   :  { %438 = vperm.xlu0 %1671, %v148_v17  }
  0x5b   :  { %443 = vperm.xlu1 %1672, %v149_v16  }
  0x5c   :  { %1642 = vmatmul.mubr.msk.bf16.gmra.mxu0 %vm645_vm1, %v1706_v18 }
  0x5e   :  { %358 = vperm.xlu0 %1671, %v132_v20  }
  0x5f   :  { %363 = vperm.xlu1 %1672, %v133_v19  }
  0x62   :  { %428 = vperm.xlu0 %1671, %v146_v22  }
  0x63   :  { %433 = vperm.xlu1 %1672, %v147_v21  }
  0x66   :  { %348 = vperm.xlu0 %1671, %v130_v24  }
  0x67   :  { %353 = vperm.xlu1 %1672, %v131_v23  }
  0x6a   :  { %418 = vperm.xlu0 %1671, %v144_v26  }
  0x6b   :  { %423 = vperm.xlu1 %1672, %v145_v25  }
  0x6e   :  { %338 = vperm.xlu0 %1671, %v128_v28  }
  0x6f   :  { %343 = vperm.xlu1 %1672, %v129_v27  }
  0x72   :  { %408 = vperm.xlu0 %1671, %v142_v30  }
  0x73   :  { %413 = vperm.xlu1 %1672, %v143_v29  }
  0x76   :  { %328 = vperm.xlu0 %1671, %v126_v32  }
  0x77   :  { %333 = vperm.xlu1 %1672, %v127_v31  }
  0x7a   :  { %398 = vperm.xlu0 %1671, %v140_v34  }
  0x7b   :  { %403 = vperm.xlu1 %1672, %v141_v33  }
  0x7d   :  { %v2104_v37 = vpop.permute.xlu0 %308 }
  0x7e   :  { %v2106_v38 = vpop.permute.xlu1 %228  ;;  %318 = vperm.xlu0 %1671, %v124_v36  }
  0x7f   :  { %323 = vperm.xlu1 %1672, %v125_v35  }
  0x81   :  { %v2114_v41 = vpop.permute.xlu0 %313 }
  0x82   :  { %v2116_v42 = vpop.permute.xlu1 %233  ;;  %1211 = vperm.xlu0 %1671, %v1205_v40  }
  0x83   :  { %1216 = vperm.xlu1 %1672, %v1206_v39  }
  0x85   :  { %v2124_v45 = vpop.permute.xlu0 %298 }
  0x86   :  { %v2126_v46 = vpop.permute.xlu1 %303  ;;  %1221 = vperm.xlu0 %1671, %v1207_v44  }
  0x87   :  { %1226 = vperm.xlu1 %1672, %v1208_v43  }
  0x89   :  { %v2134_v49 = vpop.permute.xlu0 %218 }
  0x8a   :  { %1381 = vperm.xlu0 %1671, %v1375_v48   ;;  %v2142_v52 = vpop.permute.xlu1 %223 }
  0x8b   :  { %1386 = vperm.xlu1 %1672, %v1376_v47  }
  0x8d   :  { %v2144_v53 = vpop.permute.xlu0 %288 }
  0x8e   :  { %1391 = vperm.xlu0 %1671, %v1377_v51   ;;  %v2146_v54 = vpop.permute.xlu1 %293 }
  0x8f   :  { %1396 = vperm.xlu1 %1672, %v1378_v50  }
  0x91   :  { %v2148_v55 = vpop.permute.xlu0 %208 }
  0x92   :  { %v2150_v56 = vpop.permute.xlu1 %213 }
  0x95   :  { %v2152_v57 = vpop.permute.xlu0 %278 }
  0x96   :  { %v2154_v58 = vpop.permute.xlu1 %283 }
  0x99   :  { %v2156_v59 = vpop.permute.xlu0 %198 }
  0x9a   :  { %v2158_v60 = vpop.permute.xlu1 %203 }
  0x9d   :  { %v2160_v61 = vpop.permute.xlu0 %268 }
  0x9e   :  { %v2162_v62 = vpop.permute.xlu1 %273 }
  0xa1   :  { %v189_v63 = vpop.permute.xlu0 %188 }
  0xa2   :  { %v194_v0 = vpop.permute.xlu1 %193 }
  0xa5   :  { %v2167_v2 = vpop.permute.xlu0 %258 }
  0xa6   :  { %v2169_v3 = vpop.permute.xlu1 %263 }
  0xa9   :  { %v179_v4 = vpop.permute.xlu0 %178 }
  0xaa   :  { %v184_v5 = vpop.permute.xlu1 %183 }
  0xad   :  { %v2171_v6 = vpop.permute.xlu0 %248 }
  0xae   :  { %v2173_v7 = vpop.permute.xlu1 %253 }
  0xb1   :  { %v169_v8 = vpop.permute.xlu0 %168 }
  0xb2   :  { %v174_v9 = vpop.permute.xlu1 %173 }
  0xb5   :  { %v2175_v10 = vpop.permute.xlu0 %238 }
  0xb6   :  { %v2177_v11 = vpop.permute.xlu1 %243 }
  0xb9   :  { %v159_v13 = vpop.permute.xlu0 %158 }
  0xba   :  { %v164_v18 = vpop.permute.xlu1 %163 }
  0xcc   :  { %v1603_v12 = vpop.f32.mrf.mxu0  ;;  %v2179_v28 = vpop.f32.mrf.mxu1 }
  0xcd   :  { %v791_v14 = vadd.f32 %v1603_v12, %v169_v8  ;;  %2435 = vst [vmem:[#allocation5_spill] sm:$0xff] %v2179_v28 }
  0xce   :  { %v782_v15 = vpop.f32.mrf.mxu0  ;;  %v2185_v40 = vpop.f32.mrf.mxu1 }
  0xcf   :  { %v783_v16 = vadd.f32 %v782_v15, %v159_v13  ;;  %v1039_v19 = vmul.f32 0.01, %v791_v14  ;;  %2438 = vst [vmem:[#allocation8_spill] sm:$0xff] %v2185_v40 }
  0xd0   :  { %v1604_v17 = vpop.f32.mrf.mxu0  ;;  %v2189_v8 = vpop.f32.mrf.mxu1 }
  0xd1   :  { %v794_v20 = vadd.f32 %v1604_v17, %v174_v9  ;;  %v1037_v22 = vmul.f32 0.01, %v783_v16  ;;  %v1103_v27 = vmax.f32 %v791_v14, %v1039_v19  ;;  %v2203_v19 = vpop.permute.xlu1 %473 }
  0xd2   :  { %v785_v21 = vpop.f32.mrf.mxu0  ;;  %v2199_v17 = vpop.f32.mrf.mxu1 }
  0xd3   :  { %v786_v23 = vadd.f32 %v785_v21, %v164_v18  ;;  %v1040_v24 = vmul.f32 0.01, %v794_v20  ;;  %v1101_v32 = vmax.f32 %v783_v16, %v1037_v22  ;;  %2440 = vst [vmem:[#allocation10_spill] sm:$0xff] %v2199_v17 }
  0xd4   :  { %v1607_v25 = vpop.f32.mrf.mxu0  ;;  %v2207_v21 = vpop.f32.mrf.mxu1 }
  0xd5   :  { %v1038_v26 = vmul.f32 0.01, %v786_v23  ;;  %v1104_v29 = vmax.f32 %v794_v20, %v1040_v24  ;;  %v807_v30 = vadd.f32 %v1607_v25, %v189_v63  ;;  %v2205_v20 = vpop.permute.xlu0 %468  ;;  %2441 = vst [vmem:[#allocation11_spill] sm:$0xff] %v2207_v21 }
  0xd6   :  { %v798_v31 = vpop.f32.mrf.mxu0  ;;  %v2209_v24 = vpop.f32.mrf.mxu1 }
  0xd7   :  { %v1102_v33 = vmax.f32 %v786_v23, %v1038_v26  ;;  %v799_v34 = vadd.f32 %v798_v31, %v179_v4  ;;  %v2181_v35 = vpack.c.bf16 %v1104_v29, %v1103_v27  ;;  %v1043_v43 = vmul.f32 0.01, %v807_v30  ;;  %2442 = vst [vmem:[#allocation12_spill] sm:$0xff] %v2209_v24  ;;  %v2211_v26 = vpop.permute.xlu1 %393 }
  0xd8   :  { %v1608_v36 = vpop.f32.mrf.mxu0 }
  0xd9   :  { %2436 = vst [vmem:[#allocation6_spill] sm:$0xff] %v2181_v35  ;;  %v2183_v39 = vpack.c.bf16 %v1102_v33, %v1101_v32  ;;  %v810_v44 = vadd.f32 %v1608_v36, %v194_v0  ;;  %v1041_v48 = vmul.f32 0.01, %v799_v34  ;;  %v1107_v9 = vmax.f32 %v807_v30, %v1043_v43  ;;  %v2213_v27 = vpop.permute.xlu0 %388  ;;  %v2217_v30 = vpop.f32.mrf.mxu1 }
  0xda   :  { %v801_v47 = vpop.f32.mrf.mxu0  ;;  %2443 = vst [vmem:[#allocation13_spill] sm:$0xff] %v2217_v30 }
  0xdb   :  { %2437 = vst [vmem:[#allocation7_spill] sm:$0xff] %v2183_v39  ;;  %v802_v50 = vadd.f32 %v801_v47, %v184_v5  ;;  %v1044_v51 = vmul.f32 0.01, %v810_v44  ;;  %v1105_v13 = vmax.f32 %v799_v34, %v1041_v48  ;;  %v2223_v33 = vpop.permute.xlu1 %463  ;;  %v2227_v36 = vpop.f32.mrf.mxu1 }
  0xdc   :  { %v2187_v1 = vpop.f32.mrf.mxu0  ;;  %2445 = vst [vmem:[#allocation15_spill] sm:$0xff] %v2227_v36 }
  0xdd   :  { %v1042_v63 = vmul.f32 0.01, %v802_v50  ;;  %v1108_v4 = vmax.f32 %v810_v44, %v1044_v51  ;;  %v2225_v34 = vpop.permute.xlu0 %458  ;;  %v2233_v47 = vpop.f32.mrf.mxu1 }
  0xde   :  { %v2191_v12 = vpop.f32.mrf.mxu0  ;;  %2444 = vst [vmem:[#allocation14_spill] sm:$0xff] %v2225_v34  ;;  %2446 = vst [vmem:[#allocation16_spill] sm:$0xff] %v2233_v47 }
  0xdf   :  { %v1106_v14 = vmax.f32 %v802_v50, %v1042_v63  ;;  %v2193_v15 = vpack.c.bf16 %v1108_v4, %v1107_v9  ;;  %v2237_v50 = vpop.permute.xlu1 %383  ;;  %v2241_v9 = vpop.f32.mrf.mxu1 }
  0xe0   :  { %v2195_v16 = vpop.f32.mrf.mxu0  ;;  %2447 = vst [vmem:[#allocation17_spill] sm:$0xff] %v2237_v50  ;;  %2449 = vst [vmem:[#allocation19_spill] sm:$0xff] %v2241_v9 }
  0xe1   :  { %v2197_v0 = vpack.c.bf16 %v1106_v14, %v1105_v13  ;;  %v2239_v51 = vpop.permute.xlu0 %378  ;;  %v2249_v36 = vpop.f32.mrf.mxu1 }
  0xe2   :  { %v2201_v5 = vpop.f32.mrf.mxu0  ;;  %2448 = vst [vmem:[#allocation18_spill] sm:$0xff] %v2239_v51  ;;  %2452 = vst [vmem:[#allocation22_spill] sm:$0xff] %v2249_v36 }
  0xe3   :  { %2439 = vst [vmem:[#allocation9_spill] sm:$0xff] %v2197_v0  ;;  %v2245_v14 = vpop.permute.xlu1 %453  ;;  %v2251_v47 = vpop.f32.mrf.mxu1 }
  0xe4   :  { %v1615_v18 = vpop.f32.mrf.mxu0  ;;  %2450 = vst [vmem:[#allocation20_spill] sm:$0xff] %v2245_v14  ;;  %2453 = vst [vmem:[#allocation23_spill] sm:$0xff] %v2251_v47 }
  0xe5   :  { %v2247_v24 = vpop.permute.xlu0 %448  ;;  %v839_v14 = vadd.f32 %v1615_v18, %v2106_v38  ;;  %v2260_v50 = vpop.f32.mrf.mxu1 }
  0xe6   :  { %v830_v22 = vpop.f32.mrf.mxu0  ;;  %2451 = vst [vmem:[#allocation21_spill] sm:$0xff] %v2247_v24  ;;  %2456 = vst [vmem:[#allocation26_spill] sm:$0xff] %v2260_v50 }
  0xe7   :  { %v2253_v35 = vpop.permute.xlu1 %373  ;;  %v1051_v38 = vmul.f32 0.01, %v839_v14  ;;  %v831_v18 = vadd.f32 %v830_v22, %v2134_v49 }
  0xe8   :  { %v1616_v23 = vpop.f32.mrf.mxu0  ;;  %2454 = vst [vmem:[#allocation24_spill] sm:$0xff] %v2253_v35 }
  0xe9   :  { %v2255_v40 = vpop.permute.xlu0 %368  ;;  %v842_v9 = vadd.f32 %v1616_v23, %v2116_v42  ;;  %v1049_v28 = vmul.f32 0.01, %v831_v18 }
  0xea   :  { %v833_v25 = vpop.f32.mrf.mxu0  ;;  %2455 = vst [vmem:[#allocation25_spill] sm:$0xff] %v2255_v40 }
  0xeb   :  { %v1052_v34 = vmul.f32 0.01, %v842_v9  ;;  %v834_v47 = vadd.f32 %v833_v25, %v2142_v52  ;;  %v2267_v40 = vpop.permute.xlu1 %443 }
  0xec   :  { %v2215_v29 = vpop.f32.mrf.mxu0  ;;  %2457 = vst [vmem:[#allocation27_spill] sm:$0xff] %v2267_v40 }
  0xed   :  { %v2269_v42 = vpop.permute.xlu0 %438  ;;  %v1116_v40 = vmax.f32 %v842_v9, %v1052_v34 }
  0xee   :  { %v2219_v31 = vpop.f32.mrf.mxu0  ;;  %2458 = vst [vmem:[#allocation28_spill] sm:$0xff] %v2269_v42  ;;  %v1050_v42 = vmul.f32 0.01, %v834_v47 }
  0xf0   :  { %v2221_v32 = vpop.f32.mrf.mxu0 }
  0xf1   :  { %v2291_v34 = vpop.permute.xlu0 %358 }
  0xf2   :  { %v2229_v43 = vpop.f32.mrf.mxu0  ;;  %2462 = vst [vmem:[#allocation32_spill] sm:$0xff] %v2291_v34 }
  0xf4   :  { %v2231_v44 = vpop.f32.mrf.mxu0 }
  0xf6   :  { %v2235_v48 = vpop.f32.mrf.mxu0 }
  0xf8   :  { %v1624_v63 = vpop.f32.mrf.mxu0 }
  0xfa   :  { %v2243_v4 = vpop.f32.mrf.mxu0 }
  0xfc   :  { %v1627_v13 = vpop.f32.mrf.mxu0 }
  0xfe   :  { %v878_v21 = vpop.f32.mrf.mxu0 }
  0xff   :  { %v879_v9 = vadd.f32 %v878_v21, %v2152_v57  ;;  %v815_v57 = vadd.f32 %v2191_v12, %v2156_v59  ;;  %v1113_v21 = vmax.f32 %v831_v18, %v1049_v28  ;;  %v2312_v59 = vpop.permute.xlu0 %428  ;;  %v866_v12 = vadd.f32 %v2243_v4, %v2169_v3 }
 0x100   :  { %v1628_v30 = vpop.f32.mrf.mxu0 }
 0x101   :  { %v2265_v0 = vadd.f32 %v1628_v30, %v2146_v54  ;;  %v826_v30 = vadd.f32 %v2195_v16, %v2150_v56  ;;  %v2289_v16 = vpop.permute.xlu1 %363  ;;  %v1058_v4 = vmul.f32 0.01, %v866_v12 }
 0x102   :  { %v881_v39 = vpop.f32.mrf.mxu0 }
 0x103   :  { %v1064_v50 = vmul.f32 0.01, %v2265_v0  ;;  %v882_v49 = vadd.f32 %v881_v39, %v2154_v58 }
 0x104   :  { %v1631_v51 = vpop.f32.mrf.mxu0 }
 0x105   :  { %v903_v17 = vadd.f32 %v1631_v51, %v2104_v37  ;;  %v2273_v51 = vpop.f32.mrf.mxu1 }
 0x106   :  { %v894_v24 = vpop.f32.mrf.mxu0  ;;  %2459 = vst [vmem:[#allocation29_spill] sm:$0xff] %v2273_v51 }
 0x107   :  { %v895_v36 = vadd.f32 %v894_v24, %v2124_v45  ;;  %v1067_v23 = vmul.f32 0.01, %v903_v17  ;;  %v887_v45 = vadd.f32 %v1627_v13, %v2144_v53  ;;  %v823_v53 = vadd.f32 %v2187_v1, %v2148_v55 }
 0x108   :  { %v1632_v35 = vpop.f32.mrf.mxu0  ;;  %v1115_v13 = vmax.f32 %v839_v14, %v1051_v38  ;;  %v818_v55 = vadd.f32 %v2201_v5, %v2158_v60  ;;  %v1114_v14 = vmax.f32 %v834_v47, %v1050_v42  ;;  %v874_v38 = vadd.f32 %v1624_v63, %v2162_v62  ;;  %v2310_v63 = vpop.permute.xlu1 %433 }
 0x109   :  { %v906_v37 = vadd.f32 %v1632_v35, %v2114_v41  ;;  %v1065_v52 = vmul.f32 0.01, %v895_v36  ;;  %v1131_v35 = vmax.f32 %v903_v17, %v1067_v23  ;;  %v1048_v23 = vmul.f32 0.01, %v826_v30 }
 0x10a   :  { %v897_v24 = vpop.f32.mrf.mxu0  ;;  %v1172_v1 = vpack.c.bf16 %v1116_v40, %v1115_v13  ;;  %v1047_v34 = vmul.f32 0.01, %v823_v53  ;;  %v871_v60 = vadd.f32 %v2231_v44, %v2160_v61  ;;  %v1061_v62 = vmul.f32 0.01, %v879_v9 }
 0x10b   :  { %v1068_v25 = vmul.f32 0.01, %v906_v37  ;;  %v898_v54 = vadd.f32 %v897_v24, %v2126_v46  ;;  %v2285_v46 = vpop.f32.mrf.mxu1  ;;  %v1063_v24 = vmul.f32 0.01, %v887_v45  ;;  %v1129_v58 = vmax.f32 %v895_v36, %v1065_v52 }
 0x10c   :  { %v2280_v41 = vpop.f32.mrf.mxu0  ;;  %v1046_v5 = vmul.f32 0.01, %v818_v55  ;;  %v1171_v47 = vpack.c.bf16 %v1114_v14, %v1113_v21  ;;  %v1060_v28 = vmul.f32 0.01, %v874_v38  ;;  %v1111_v52 = vmax.f32 %v823_v53, %v1047_v34  ;;  %v2324_v34 = vpop.permute.xlu1 %353 }
 0x10d   :  { %2460 = vst [vmem:[#allocation30_spill] sm:$0xff] %v2280_v41  ;;  %v1132_v22 = vmax.f32 %v906_v37, %v1068_v25  ;;  %v1066_v51 = vmul.f32 0.01, %v898_v54  ;;  %v1128_v25 = vmax.f32 %v2265_v0, %v1064_v50  ;;  %v2302_v36 = vpop.f32.mrf.mxu1  ;;  %v1127_v40 = vmax.f32 %v887_v45, %v1063_v24 }
 0x10e   :  { %v2287_v56 = vpop.f32.mrf.mxu0  ;;  %v1112_v0 = vmax.f32 %v826_v30, %v1048_v23  ;;  %v1045_v61 = vmul.f32 0.01, %v815_v57  ;;  %v863_v30 = vadd.f32 %v2235_v48, %v2167_v2  ;;  %v858_v13 = vadd.f32 %v2221_v32, %v2173_v7 }
 0x10f   :  { %2461 = vst [vmem:[#allocation31_spill] sm:$0xff] %v2287_v56  ;;  %v1130_v39 = vmax.f32 %v898_v54, %v1066_v51  ;;  %v1180_v17 = vpack.c.bf16 %v1132_v22, %v1131_v35  ;;  %v1062_v56 = vmul.f32 0.01, %v882_v49  ;;  %v1178_v18 = vpack.c.bf16 %v1128_v25, %v1127_v40  ;;  %v1663_v44 = vpop.f32.mrf.mxu1 }
 0x110   :  { %v2296_v37 = vpop.f32.mrf.mxu0  ;;  %v1059_v54 = vmul.f32 0.01, %v871_v60  ;;  %v1170_v35 = vpack.c.bf16 %v1112_v0, %v1111_v52  ;;  %v1110_v22 = vmax.f32 %v818_v55, %v1046_v5  ;;  %v1124_v3 = vmax.f32 %v874_v38, %v1060_v28  ;;  %v2336_v38 = vpop.permute.xlu1 %423  ;;  %v2464_v52 = vld [vmem:[#allocation9_spill] sm:$0xff] }
 0x111   :  { %1541 = vmatprep.subr.bf16.mxu1 %v1180_v17  ;;  %v1179_v41 = vpack.c.bf16 %v1130_v39, %v1129_v58  ;;  %v1126_v42 = vmax.f32 %v882_v49, %v1062_v56  ;;  %v1109_v24 = vmax.f32 %v815_v57, %v1045_v61  ;;  %v1022_v56 = vpop.f32.mrf.mxu1  ;;  %v855_v2 = vadd.f32 %v2215_v29, %v2171_v6  ;;  %v2328_v58 = vpop.permute.xlu0 %348 }
 0x112   :  { %v2304_v51 = vpop.f32.mrf.mxu0  ;;  %1542 = vmatpush3.bf16.msra.mxu1 %v1172_v1  ;;  %v1123_v48 = vmax.f32 %v871_v60, %v1059_v54  ;;  %v1056_v7 = vmul.f32 0.01, %v858_v13  ;;  %v850_v32 = vadd.f32 %v2229_v43, %v2177_v11  ;;  %v1122_v17 = vmax.f32 %v866_v12, %v1058_v4 }
 0x113   :  { %1543 = vmatprep.subr.bf16.mxu1 %v1179_v41  ;;  %v1125_v41 = vmax.f32 %v879_v9, %v1061_v62  ;;  %v1057_v9 = vmul.f32 0.01, %v863_v30  ;;  %v1169_v39 = vpack.c.bf16 %v1110_v22, %v1109_v24  ;;  %v1664_v1 = vpop.f32.mrf.mxu1  ;;  %v1055_v14 = vmul.f32 0.01, %v855_v2  ;;  %v2469_v24 = vld [vmem:[#allocation18_spill] sm:$0xff] }
 0x114   :  { %v2308_v50 = vpop.f32.mrf.mxu0  ;;  %v1176_v55 = vpack.c.bf16 %v1124_v3, %v1123_v48  ;;  %v847_v6 = vadd.f32 %v2219_v31, %v2175_v10  ;;  %v1120_v25 = vmax.f32 %v858_v13, %v1056_v7  ;;  %v1034_v57 = vadd.f32 %v1664_v1, %v2203_v19 }
 0x115   :  { %v1177_v53 = vpack.c.bf16 %v1126_v42, %v1125_v41  ;;  %v1121_v29 = vmax.f32 %v863_v30, %v1057_v9  ;;  %v1054_v21 = vmul.f32 0.01, %v850_v32  ;;  %v2339_v43 = vpop.permute.xlu0 %418  ;;  %v1025_v40 = vpop.f32.mrf.mxu1  ;;  %v1119_v62 = vmax.f32 %v855_v2, %v1055_v14  ;;  %v2463_v42 = vld [vmem:[#allocation5_spill] sm:$0xff]  ;;  %v2470_v2 = vld [vmem:[#allocation8_spill] sm:$0xff]  ;;  %v2471_v9 = vld [vmem:[#allocation6_spill] sm:$0xff] }
 0x116   :  { %v2316_v45 = vpop.f32.mrf.mxu0  ;;  %1544 = vmatpush3.bf16.msra.mxu1 %v1171_v47  ;;  %v1031_v0 = vadd.f32 %v1663_v44, %v2205_v20  ;;  %v1053_v5 = vmul.f32 0.01, %v847_v6  ;;  %v970_v10 = vadd.f32 %v2189_v8, %v2211_v26  ;;  %v1100_v31 = vmul.f32 0.01, %v1034_v57  ;;  %v2465_v44 = vld [vmem:[#allocation14_spill] sm:$0xff]  ;;  %v2466_v8 = vld [vmem:[#allocation17_spill] sm:$0xff] }
 0x117   :  { %1545 = vmatprep.subr.bf16.mxu1 %v1178_v18  ;;  %v1175_v11 = vpack.c.bf16 %v1122_v17, %v1121_v29  ;;  %v1118_v47 = vmax.f32 %v850_v32, %v1054_v21  ;;  %v1026_v19 = vadd.f32 %v1025_v40, %v2223_v33  ;;  %v1174_v12 = vpack.c.bf16 %v1120_v25, %v1119_v62  ;;  %v2467_v26 = vld [vmem:[#allocation10_spill] sm:$0xff]  ;;  %v2468_v33 = vld [vmem:[#allocation20_spill] sm:$0xff]  ;;  %v2475_v29 = vld [vmem:[#allocation27_spill] sm:$0xff] }
 0x118   :  { %v2322_v49 = vpop.f32.mrf.mxu0  ;;  %v967_v18 = vadd.f32 %v2463_v42, %v2213_v27  ;;  %v1099_v61 = vmul.f32 0.01, %v1031_v0  ;;  %v1117_v20 = vmax.f32 %v847_v6, %v1053_v5  ;;  %v1023_v54 = vadd.f32 %v1022_v56, %v2465_v44  ;;  %v2472_v56 = vld [vmem:[#allocation21_spill] sm:$0xff]  ;;  %v2474_v14 = vld [vmem:[#allocation24_spill] sm:$0xff] }
 0x119   :  { %v1084_v30 = vmul.f32 0.01, %v970_v10  ;;  %v962_v41 = vadd.f32 %v2467_v26, %v2466_v8  ;;  %v1018_v22 = vadd.f32 %v2285_v46, %v2468_v33  ;;  %v1164_v13 = vmax.f32 %v1034_v57, %v1100_v31  ;;  %v1707_v62 = vld [vmem:[%s2431_s3] ss:$16 sps:$4 sm:$0xff]  }
 0x11a   :  { %1546 = vmatpush3.bf16.msra.mxu1 %v1170_v35  ;;  %v2332_v23 = vpop.f32.mrf.mxu0  ;;  %v2354_v35 = vpop.permute.xlu0 %338  ;;  %v1098_v27 = vmul.f32 0.01, %v1026_v19  ;;  %v1173_v4 = vpack.c.bf16 %v1118_v47, %v1117_v20  ;;  %v959_v48 = vadd.f32 %v2470_v2, %v2469_v24  ;;  %v1163_v32 = vmax.f32 %v1031_v0, %v1099_v61  ;;  %v2479_v61 = vld [vmem:[#allocation28_spill] sm:$0xff]  ;;  %v2480_v20 = vld [vmem:[#allocation29_spill] sm:$0xff] }
 0x11b   :  { %1547 = vmatprep.subr.bf16.mxu1 %v1177_v53  ;;  %v1083_v53 = vmul.f32 0.01, %v967_v18  ;;  %v1097_v17 = vmul.f32 0.01, %v1023_v54  ;;  %v1082_v1 = vmul.f32 0.01, %v962_v41  ;;  %v2366_v25 = vadd.f32 %v2302_v36, %v2475_v29 }
 0x11c   :  { %v1643_v60 = vpop.f32.mrf.mxu0  ;;  %v1096_v6 = vmul.f32 0.01, %v1018_v22  ;;  %v1162_v21 = vmax.f32 %v1026_v19, %v1098_v27  ;;  %v1196_v40 = vpack.c.bf16 %v1164_v13, %v1163_v32  ;;  %v1081_v5 = vmul.f32 0.01, %v959_v48  ;;  %v1710_v36 = vld [vmem:[%s2431_s3 + $0x24] ss:$16 sps:$4 sm:$0xff]  }
 0x11d   :  { %v1147_v0 = vmax.f32 %v967_v18, %v1083_v53  ;;  %v1007_v44 = vadd.f32 %v2480_v20, %v2479_v61  ;;  %v1146_v8 = vmax.f32 %v962_v41, %v1082_v1  ;;  %v2481_v33 = vld [vmem:[#allocation16_spill] sm:$0xff]  ;;  %v1094_v27 = vmul.f32 0.01, %v2366_v25  ;;  %v2483_v41 = vld [vmem:[#allocation23_spill] sm:$0xff] }
 0x11e   :  { %1548 = vmatpush3.bf16.msra.mxu1 %v1169_v39  ;;  %v942_v28 = vpop.f32.mrf.mxu0  ;;  %v2473_v39 = vld [vmem:[#allocation26_spill] sm:$0xff]  ;;  %v409_v47 = vpop.permute.xlu0 %408  ;;  %v1160_v13 = vmax.f32 %v1018_v22, %v1096_v6  ;;  %v2482_v2 = vld [vmem:[#allocation32_spill] sm:$0xff] }
 0x11f   :  { %1549 = vmatprep.subr.bf16.mxu1 %v1176_v55  ;;  %v1015_v7 = vadd.f32 %v2473_v39, %v2472_v56  ;;  %v1148_v55 = vmax.f32 %v970_v10, %v1084_v30  ;;  %v2476_v10 = vld [vmem:[#allocation22_spill] sm:$0xff]  ;;  %v1161_v30 = vmax.f32 %v1023_v54, %v1097_v17  ;;  %v943_v54 = vadd.f32 %v942_v28, %v2482_v2 }
 0x120   :  { %v1644_v3 = vpop.f32.mrf.mxu0  ;;  %v2373_v31 = vadd.f32 %v2476_v10, %v2310_v63  ;;  %v1093_v22 = vmul.f32 0.01, %v1007_v44  ;;  %v2486_v10 = vld [vmem:[#allocation11_spill] sm:$0xff] }
 0x121   :  { %v954_v46 = vadd.f32 %v1644_v3, %v2474_v14  ;;  %v1095_v19 = vmul.f32 0.01, %v1015_v7  ;;  %v1188_v18 = vpack.c.bf16 %v1148_v55, %v1147_v0  ;;  %v1195_v3 = vpack.c.bf16 %v1162_v21, %v1161_v30 }
 0x122   :  { %1550 = vmatpush3.bf16.msra.mxu1 %v2193_v15  ;;  %v2349_v15 = vpop.permute.xlu1 %343  ;;  %v1092_v53 = vmul.f32 0.01, %v2373_v31  ;;  %v329_v17 = vpop.permute.xlu0 %328  ;;  %v1158_v14 = vmax.f32 %v2366_v25, %v1094_v27  ;;  %v1077_v29 = vmul.f32 0.01, %v943_v54  ;;  %v1157_v25 = vmax.f32 %v1007_v44, %v1093_v22  ;;  %v2490_v22 = vld [vmem:[#allocation31_spill] sm:$0xff] }
 0x123   :  { %1551 = vmatprep.subr.bf16.mxu1 %v1175_v11  ;;  %v945_v11 = vpop.f32.mrf.mxu0  ;;  %v1080_v26 = vmul.f32 0.01, %v954_v46 }
 0x124   :  { %v946_v63 = vadd.f32 %v945_v11, %v2289_v16  ;;  %v2484_v16 = vld [vmem:[#allocation19_spill] sm:$0xff]  ;;  %v1141_v61 = vmax.f32 %v943_v54, %v1077_v29 }
 0x125   :  { %v991_v56 = vadd.f32 %v2484_v16, %v2339_v43  ;;  %v1144_v55 = vmax.f32 %v954_v46, %v1080_v26  ;;  %v935_v43 = vadd.f32 %v2308_v50, %v2328_v58  ;;  %v2485_v58 = vld [vmem:[#allocation13_spill] sm:$0xff]  ;;  %v2487_v26 = vld [vmem:[#allocation15_spill] sm:$0xff] }
 0x126   :  { %1552 = vmatpush3.bf16.msra.mxu1 %v2464_v52  ;;  %v414_v57 = vpop.permute.xlu1 %413  ;;  %v2478_v52 = vld [vmem:[#allocation7_spill] sm:$0xff]  ;;  %v1078_v1 = vmul.f32 0.01, %v946_v63 }
 0x127   :  { %1553 = vmatprep.subr.bf16.mxu1 %v1174_v12  ;;  %v2477_v12 = vld [vmem:[#allocation25_spill] sm:$0xff]  ;;  %v1089_v21 = vmul.f32 0.01, %v991_v56 }
 0x128   :  { %v951_v42 = vadd.f32 %v1643_v60, %v2477_v12  ;;  %v999_v60 = vadd.f32 %v2481_v33, %v2312_v59  ;;  %v1159_v59 = vmax.f32 %v1015_v7, %v1095_v19  ;;  %v1142_v0 = vmax.f32 %v946_v63, %v1078_v1  ;;  %v2488_v33 = vld [vmem:[#allocation12_spill] sm:$0xff] }
 0x129   :  { %v983_v12 = vadd.f32 %v2486_v10, %v409_v47  ;;  %v927_v19 = vadd.f32 %v2316_v45, %v2354_v35 }
 0x12a   :  { %1554 = vmatpush3.bf16.msra.mxu1 %v2471_v9  ;;  %v1079_v24 = vmul.f32 0.01, %v951_v42  ;;  %v994_v9 = vadd.f32 %v2483_v41, %v2336_v38  ;;  %v334_v39 = vpop.permute.xlu1 %333  ;;  %v1091_v28 = vmul.f32 0.01, %v999_v60  ;;  %v1194_v6 = vpack.c.bf16 %v1160_v13, %v1159_v59  ;;  %v1712_v38 = vld [vmem:[%s2431_s3 + $0x20] ss:$16 sps:$4 sm:$0xff]  }
 0x12b   :  { %1555 = vmatprep.subr.bf16.mxu1 %v1173_v4  ;;  %v1145_v4 = vmax.f32 %v959_v48, %v1081_v5  ;;  %v938_v48 = vadd.f32 %v2322_v49, %v2324_v34  ;;  %v1715_v49 = vld [vmem:[%s2431_s3 + $0xc] ss:$16 sps:$4 sm:$0xff]   ;;  %v1156_v34 = vmax.f32 %v2373_v31, %v1092_v53  ;;  %v986_v5 = vadd.f32 %v2485_v58, %v414_v57 }
 0x12c   :  { %v1143_v7 = vmax.f32 %v951_v42, %v1079_v24  ;;  %v1090_v46 = vmul.f32 0.01, %v994_v9  ;;  %v1155_v50 = vmax.f32 %v999_v60, %v1091_v28  ;;  %v1075_v31 = vmul.f32 0.01, %v935_v43  ;;  %v2489_v13 = vld [vmem:[#allocation30_spill] sm:$0xff] }
 0x12d   :  { %v1187_v32 = vpack.c.bf16 %v1146_v8, %v1145_v4  ;;  %v1076_v11 = vmul.f32 0.01, %v938_v48  ;;  %v922_v44 = vadd.f32 %v2296_v37, %v334_v39  ;;  %v1185_v47 = vpack.c.bf16 %v1142_v0, %v1141_v61 }
 0x12e   :  { %1556 = vmatpush3.bf16.msra.mxu1 %v2478_v52  ;;  %v404_v42 = vpop.permute.xlu1 %403  ;;  %v1193_v52 = vpack.c.bf16 %v1158_v14, %v1157_v25  ;;  %v1154_v20 = vmax.f32 %v994_v9, %v1090_v46  ;;  %v1087_v8 = vmul.f32 0.01, %v983_v12  ;;  %v919_v45 = vadd.f32 %v2489_v13, %v329_v17  ;;  %v1716_v46 = vld [vmem:[%s2431_s3 + $0x2c] ss:$16 sps:$4 sm:$0xff]  }
 0x12f   :  { %1569 = vmatprep.subr.bf16.mxu1 %v1196_v40  ;;  %v930_v40 = vadd.f32 %v2332_v23, %v2349_v15  ;;  %v1153_v23 = vmax.f32 %v991_v56, %v1089_v21  ;;  %v1192_v15 = vpack.c.bf16 %v1156_v34, %v1155_v50  ;;  %v1140_v57 = vmax.f32 %v938_v48, %v1076_v11  ;;  %v1713_v34 = vld [vmem:[%s2431_s3 + $0x8] ss:$16 sps:$4 sm:$0xff]  }
 0x130   :  { %v978_v63 = vadd.f32 %v2487_v26, %v404_v42  ;;  %v1139_v35 = vmax.f32 %v935_v43, %v1075_v31  ;;  %v1073_v27 = vmul.f32 0.01, %v927_v19  ;;  %v1072_v53 = vmul.f32 0.01, %v922_v44  ;;  %v1718_v21 = vld [vmem:[%s2431_s3 + $0x28] ss:$16 sps:$4 sm:$0xff]  }
 0x131   :  { %1302 = vmatmul.mubr.bf16.vlgmr.msra.gmra.mxu1 %v1707_v62  ;;  %v1186_v62 = vpack.c.bf16 %v1144_v55, %v1143_v7  ;;  %v1074_v30 = vmul.f32 0.01, %v930_v40  ;;  %v1191_v4 = vpack.c.bf16 %v1154_v20, %v1153_v23  ;;  %v1151_v41 = vmax.f32 %v983_v12, %v1087_v8  ;;  %s1742_s3 = smov [#allocation2]  }
 0x132   :  { %1570 = vmatpush3.bf16.msra.mxu1 %v1188_v18  ;;  %1309 = vmatprep.mubr.bf16.mxu1 %v1710_v36  ;;  %v399_v36 = vpop.permute.xlu0 %398  ;;  %v1088_v18 = vmul.f32 0.01, %v986_v5  ;;  %v1184_v24 = vpack.c.bf16 %v1140_v57, %v1139_v35  ;;  %v1086_v9 = vmul.f32 0.01, %v978_v63  ;;  %v1071_v59 = vmul.f32 0.01, %v919_v45 }
 0x133   :  { %1571 = vmatprep.subr.bf16.mxu1 %v1195_v3  ;;  %v975_v60 = vadd.f32 %v2488_v33, %v399_v36  ;;  %v324_v3 = vpop.permute.xlu1 %323  ;;  %v1138_v2 = vmax.f32 %v930_v40, %v1074_v30  ;;  %v1136_v17 = vmax.f32 %v922_v44, %v1072_v53  ;;  %s1425_s18 = sshll.u32 %s1742_s3, 4  ;;  %s1426_s18 = int_to_ptr.vmem [resolvable:$true] %s1425_s18 }
 0x134   :  { %v914_v37 = vadd.f32 %v2304_v51, %v324_v3  ;;  %v1152_v54 = vmax.f32 %v986_v5, %v1088_v18  ;;  %v1150_v1 = vmax.f32 %v978_v63, %v1086_v9  ;;  %v1135_v51 = vmax.f32 %v919_v45, %v1071_v59  ;;  %s1719_s2 = scalar_lea.vmem %s1426_s18, 16  ;;  %s1723_s19 = scalar_lea.vmem %s1426_s18, 32 }
 0x135   :  { %v1085_v16 = vmul.f32 0.01, %v975_v60  ;;  %p1720_p0 = scmp.ne.s32.totalorder %s1426_s18, %s1719_s2  ;;  %p1724_p1 = scmp.lt.s32.totalorder %s1426_s18, %s1426_s18 }
 0x136   :  { %1572 = vmatpush3.bf16.msra.mxu1 %v1187_v32  ;;  %v319_v56 = vpop.permute.xlu0 %318  ;;  %v1137_v32 = vmax.f32 %v927_v19, %v1073_v27  ;;  %v1070_v48 = vmul.f32 0.01, %v914_v37  ;;  %v1190_v14 = vpack.c.bf16 %v1152_v54, %v1151_v41  ;;  %p1725_p2 = scmp.lt.s32.totalorder %s1723_s19, %s1719_s2 }
 0x137   :  { %1573 = vmatprep.subr.bf16.mxu1 %v1194_v6  ;;  %v911_v39 = vadd.f32 %v2490_v22, %v319_v56  ;;  %v1149_v28 = vmax.f32 %v975_v60, %v1085_v16 }
 0x138   :  { %v1183_v55 = vpack.c.bf16 %v1138_v2, %v1137_v32  ;;  %v1134_v43 = vmax.f32 %v914_v37, %v1070_v48  ;;  %p1726_p3 = por %p1725_p2, %p1724_p1 }
 0x139   :  { %1310 = vmatmul.mubr.bf16.gmra.mxu1 %v1712_v38  ;;  %v1069_v6 = vmul.f32 0.01, %v911_v39  ;;  %v1182_v38 = vpack.c.bf16 %v1136_v17, %v1135_v51  ;;  %v1189_v7 = vpack.c.bf16 %v1150_v1, %v1149_v28 }
 0x13a   :  { %1574 = vmatpush3.bf16.msra.mxu1 %v1186_v62  ;;  %1350 = vmatprep.mubr.bf16.mxu1 %v1715_v49  ;;  %v1212_v12 = vpop.permute.xlu0 %1211  ;;  %p1727_p4 = pnand %p1726_p3, %p1720_p0 }
 0x13b   :  { %1575 = vmatprep.subr.bf16.mxu1 %v1193_v52  ;;  %v1133_v29 = vmax.f32 %v911_v39, %v1069_v6  ;;  %v1217_v52 = vpop.permute.xlu1 %1216 }
 0x13d   :  { %v1181_v49 = vpack.c.bf16 %v1134_v43, %v1133_v29 }
 0x13e   :  { %1576 = vmatpush3.bf16.msra.mxu1 %v1185_v47 }
 0x13f   :  { %1577 = vmatprep.subr.bf16.mxu1 %v1192_v15  ;;  %v1222_v15 = vpop.permute.xlu0 %1221  ;;  %v1227_v18 = vpop.permute.xlu1 %1226 }
 0x142   :  { %1578 = vmatpush3.bf16.msra.mxu1 %v1184_v24 }
 0x143   :  { %1579 = vmatprep.subr.bf16.mxu1 %v1191_v4  ;;  %v1382_v27 = vpop.permute.xlu0 %1381  ;;  %v1387_v24 = vpop.permute.xlu1 %1386 }
 0x146   :  { %1580 = vmatpush3.bf16.msra.mxu1 %v1183_v55 }
 0x147   :  { %1581 = vmatprep.subr.bf16.mxu1 %v1190_v14  ;;  %v1392_v39 = vpop.permute.xlu0 %1391  ;;  %v1397_v14 = vpop.permute.xlu1 %1396 }
 0x14a   :  { %1582 = vmatpush3.bf16.msra.mxu1 %v1182_v38 }
 0x14b   :  { %1583 = vmatprep.subr.bf16.mxu1 %v1189_v7 }
 0x14e   :  { %1584 = vmatpush3.bf16.msra.mxu1 %v1181_v49 }
 0x151   :  { %1351 = vmatmul.mubr.bf16.vlgmr.msra.gmra.mxu1 %v1713_v34 }
 0x152   :  { %1358 = vmatprep.mubr.bf16.mxu1 %v1716_v46 }
 0x159   :  { %1359 = vmatmul.mubr.bf16.gmra.mxu1 %v1718_v21 }
 0x1f1   :  { %v1557_v25 = vpop.f32.mrf.mxu1 }
 0x1f3   :  { %v1558_v11 = vpop.f32.mrf.mxu1 }
 0x1f4   :  { %v1559_v10 = vadd.f32 %v1558_v11, %v1557_v25 }
 0x1f5   :  { %v1560_v40 = vpop.f32.mrf.mxu1 }
 0x1f6   :  { %v1304_v31 = vadd.f32 %v1559_v10, %v1212_v12 }
 0x1f7   :  { %v1561_v62 = vpop.f32.mrf.mxu1 }
 0x1f8   :  { %v1562_v19 = vadd.f32 %v1561_v62, %v1560_v40 }
 0x1f9   :  { %v1563_v0 = vpop.f32.mrf.mxu1 }
 0x1fa   :  { %v1307_v57 = vadd.f32 %v1562_v19, %v1217_v52 }
 0x1fb   :  { %v1564_v50 = vpop.f32.mrf.mxu1 }
 0x1fc   :  { %v1565_v30 = vadd.f32 %v1564_v50, %v1563_v0 }
 0x1fd   :  { %v1566_v58 = vpop.f32.mrf.mxu1 }
 0x1fe   :  { %v1312_v60 = vadd.f32 %v1565_v30, %v1222_v15 }
 0x1ff   :  { %v1567_v5 = vpop.f32.mrf.mxu1 }
 0x200   :  { %v1568_v13 = vadd.f32 %v1567_v5, %v1566_v58 }
 0x202   :  { %v1315_v54 = vadd.f32 %v1568_v13, %v1227_v18 }
 0x211   :  { %v1585_v42 = vpop.f32.mrf.mxu1 }
 0x213   :  { %v1586_v36 = vpop.f32.mrf.mxu1 }
 0x214   :  { %v1587_v61 = vadd.f32 %v1586_v36, %v1585_v42 }
 0x215   :  { %v1588_v20 = vpop.f32.mrf.mxu1 }
 0x216   :  { %v1353_v23 = vadd.f32 %v1587_v61, %v1304_v31 }
 0x217   :  { %v1589_v44 = vpop.f32.mrf.mxu1 }
 0x218   :  { %v1590_v47 = vadd.f32 %v1589_v44, %v1588_v20  ;;  %v1367_v26 = vmul.f32 0.01, %v1353_v23 }
 0x219   :  { %v1591_v8 = vpop.f32.mrf.mxu1 }
 0x21a   :  { %v1356_v63 = vadd.f32 %v1590_v47, %v1307_v57  ;;  %v1371_v4 = vmax.f32 %v1353_v23, %v1367_v26 }
 0x21b   :  { %v1592_v33 = vpop.f32.mrf.mxu1 }
 0x21c   :  { %v1368_v45 = vmul.f32 0.01, %v1356_v63  ;;  %v1593_v35 = vadd.f32 %v1592_v33, %v1591_v8  ;;  %v1399_v56 = vmul.f32 %v1382_v27, %v1371_v4 }
 0x21d   :  { %v1594_v3 = vpop.f32.mrf.mxu1 }
 0x21e   :  { %v1372_v53 = vmax.f32 %v1356_v63, %v1368_v45  ;;  %v1361_v37 = vadd.f32 %v1593_v35, %v1312_v60  ;;  %v1404_v55 = vsel %vm1403_vm2, %v1399_v56, 0.0 }
 0x21f   :  { %v1595_v2 = vpop.f32.mrf.mxu1 }
 0x220   :  { %v1400_v41 = vmul.f32 %v1387_v24, %v1372_v53  ;;  %v1369_v9 = vmul.f32 0.01, %v1361_v37  ;;  %v1596_v16 = vadd.f32 %v1595_v2, %v1594_v3 }
 0x222   :  { %v1373_v59 = vmax.f32 %v1361_v37, %v1369_v9  ;;  %v1364_v22 = vadd.f32 %v1596_v16, %v1315_v54  ;;  %v1405_v32 = vsel %vm1403_vm2, %v1400_v41, 0.0 }
 0x223   :  { %v1406_v51 = vadd.f32 %v1405_v32, %v1404_v55 }
 0x224   :  { %v1401_v17 = vmul.f32 %v1392_v39, %v1373_v59  ;;  %v1370_v48 = vmul.f32 0.01, %v1364_v22 }
 0x226   :  { %v1407_v1 = vsel %vm1403_vm2, %v1401_v17, 0.0  ;;  %v1374_v28 = vmax.f32 %v1364_v22, %v1370_v48 }
 0x227   :  { %v1408_v38 = vadd.f32 %v1407_v1, %v1406_v51 }
 0x228   :  { %v1402_v6 = vmul.f32 %v1397_v14, %v1374_v28 }
 0x22a   :  { %v1409_v43 = vsel %vm1403_vm2, %v1402_v6, 0.0 }
 0x22b   :  { %v1410_v7 = vadd.f32 %v1409_v43, %v1408_v38 }
 0x22d   :  { %v1411_v29 = vrot.slane %v1410_v7, 4 }
 0x22f   :  { %v1412_v49 = vadd.f32 %v1411_v29, %v1410_v7 }
 0x231   :  { %v1413_v34 = vrot.slane %v1412_v49, 2 }
 0x233   :  { %v1414_v46 = vadd.f32 %v1413_v34, %v1412_v49 }
 0x235   :  { %v1415_v21 = vrot.slane %v1414_v46, 1 }
 0x237   :  { %v1416_v25 = vadd.f32 %v1415_v21, %v1414_v46 }
 0x239   :  { %1418 = vst.msk [vmem:[#allocation2] sm:$0x1] %vm1417_vm3, %v1416_v25 }
 0x23a   :  { %1730 = shalt.err (!%p1727_p4)
}
 0x23b   :  { %1428 = dma.vmem_to_hbm [thread:$0]  %s1426_s18, 16, %s2434_s6, [#allocation3]  }
 0x23c   :  { %1739 = dma.done.wait [#allocation3], 16  }
 0x23d   :  { %1740 = vsyncadd [#allocation3], 4294967280 }
 0x23e   :  { %1432 = vsyncpa [#allocation3], 1 }

</bundles_post_ra>
